<compile_context>
chip_gen: v5e
topology: v5e:2x2
jax: 0.10.0
libtpu: 0.0.40
codegen_flags: <defaults>
</compile_context>

<pallas_src>
import functools

import jax
import jax.numpy as jnp
from jax.experimental import pallas as pl
from jax.experimental.pallas import tpu as pltpu


def _round_up(x, m):
    return ((x + m - 1) // m) * m


def _pick_tile(total, candidates):
    """Largest candidate that evenly divides `total`, else `total` itself."""
    for c in candidates:
        if total >= c and total % c == 0:
            return c
    return total


# --------------------------------------------------------------------------- #
# Kernels
# --------------------------------------------------------------------------- #
def _classifier_kernel_single_k(x_ref, w_ref, b_ref, o_ref):
    """One (tm, tn) output tile, full K in a single MXU pass (no scratch)."""
    o_ref[...] = (
        jnp.dot(
            x_ref[...].astype(w_ref.dtype),
            w_ref[...],
            preferred_element_type=jnp.float32,
        )
        + b_ref[...]
    ).astype(o_ref.dtype)


def _classifier_kernel_multi_k(x_ref, w_ref, b_ref, o_ref, acc_ref):
    """One (tm, tn) output tile, accumulated over the K (embed_dim) grid axis."""
    k = pl.program_id(2)

    @pl.when(k == 0)
    def _():
        acc_ref[...] = jnp.zeros_like(acc_ref)

    acc_ref[...] += jnp.dot(
        x_ref[...].astype(w_ref.dtype),
        w_ref[...],
        preferred_element_type=jnp.float32,
    )

    @pl.when(k == pl.num_programs(2) - 1)
    def _():
        o_ref[...] = (acc_ref[...] + b_ref[...]).astype(o_ref.dtype)


# --------------------------------------------------------------------------- #
# Parameter preparation (runs at init / update() time, NOT per forward)
# --------------------------------------------------------------------------- #
def prepare_classifier_params(weights, biases, compute_dtype=jnp.float32):
    """Column-stack all heads ONCE.

    weights: list of (nb_classes_i, D) arrays (PyTorch nn.Linear layout)
    biases:  list of (nb_classes_i,) arrays
    Returns (w_stacked, b_stacked, n_classes):
      w_stacked : (D, C_pad) in compute_dtype, classes zero-padded to a 128 multiple
      b_stacked : (1, C_pad) float32, zero in padded columns
      n_classes : true (unpadded) total class count
    """
    w = jnp.concatenate([w.T for w in weights], axis=1)   # (D, C_total)
    b = jnp.concatenate(biases, axis=0)[None, :]          # (1, C_total)
    n_classes = int(w.shape[1])
    c_pad = _round_up(n_classes, 128)
    if c_pad != n_classes:
        w = jnp.pad(w, ((0, 0), (0, c_pad - n_classes)))
        b = jnp.pad(b, ((0, 0), (0, c_pad - n_classes)))
    return w.astype(compute_dtype), b.astype(jnp.float32), n_classes


# --------------------------------------------------------------------------- #
# Forward
# --------------------------------------------------------------------------- #
@functools.partial(jax.jit, static_argnames=("n_classes",))
def incremental_classifier_forward(x, w_stacked, b_stacked, *, n_classes):
    """out = concat([head_i(x) for i in heads], dim=1)  (feat_expand=False)."""
    B, D = x.shape
    Dw, C_pad = w_stacked.shape
    assert Dw == D, "embed_dim mismatch between x and stacked weights"
    assert C_pad % 128 == 0

    out_dtype = x.dtype

    # ---- tile sizes -------------------------------------------------------
    tm = min(_round_up(B, 8), 256)            # sublane-aligned batch tile
    B_pad = _round_up(B, tm)
    tn = _pick_tile(C_pad, (512, 256, 128))   # lane-dense class tile
    tk = _pick_tile(D, (512, 256)) if D >= 1024 else D
    k_steps = pl.cdiv(D, tk)

    # ---- pad activations (cheap: x is tiny vs the weight stream) ----------
    if B_pad != B:
        x_in = jnp.pad(x, ((0, B_pad - B), (0, 0)))
    else:
        x_in = x

    # ---- VMEM budget + cost estimate --------------------------------------
    isize_x = jnp.dtype(x.dtype).itemsize
    isize_w = jnp.dtype(w_stacked.dtype).itemsize
    isize_o = jnp.dtype(out_dtype).itemsize
    vmem_bytes = (2 * tm * tk * isize_x        # x double buffer
                  + 2 * tk * tn * isize_w      # weight double buffer
                  + 2 * tn * 4                 # bias double buffer
                  + 2 * tm * tn * isize_o      # output double buffer
                  + (tm * tn * 4 if k_steps > 1 else 0))  # f32 accumulator
    vmem_limit = int(min(max(2 * vmem_bytes, 16 * 1024 * 1024),
                         32 * 1024 * 1024))

    cost = pl.CostEstimate(
        flops=2 * B_pad * D * C_pad,
        transcendentals=0,
        bytes_accessed=(B_pad * D * isize_x
                        + D * C_pad * isize_w
                        + C_pad * 4
                        + B_pad * C_pad * isize_o),
    )

    if k_steps == 1:
        # Common case: whole embed_dim fits one tile -> no accumulator scratch,
        # 2-D grid, both axes parallel (megacore shardable on v7x).
        grid_spec = pltpu.PrefetchScalarGridSpec(
            num_scalar_prefetch=0,
            grid=(B_pad // tm, C_pad // tn),
            in_specs=[
                pl.BlockSpec((tm, D), lambda i, j: (i, 0)),    # x
                pl.BlockSpec((D, tn), lambda i, j: (0, j)),    # stacked W
                pl.BlockSpec((1, tn), lambda i, j: (0, j)),    # stacked bias
            ],
            out_specs=pl.BlockSpec((tm, tn), lambda i, j: (i, j)),
        )
        kernel = _classifier_kernel_single_k
        dim_sem = ("parallel", "parallel")
    else:
        grid_spec = pltpu.PrefetchScalarGridSpec(
            num_scalar_prefetch=0,
            grid=(B_pad // tm, C_pad // tn, k_steps),
            in_specs=[
                pl.BlockSpec((tm, tk), lambda i, j, k: (i, k)),   # x
                pl.BlockSpec((tk, tn), lambda i, j, k: (k, j)),   # stacked W
                pl.BlockSpec((1, tn), lambda i, j, k: (0, j)),    # stacked bias
            ],
            out_specs=pl.BlockSpec((tm, tn), lambda i, j, k: (i, j)),
            scratch_shapes=[pltpu.VMEM((tm, tn), jnp.float32)],
        )
        kernel = _classifier_kernel_multi_k
        dim_sem = ("parallel", "parallel", "arbitrary")

    out = pl.pallas_call(
        kernel,
        out_shape=jax.ShapeDtypeStruct((B_pad, C_pad), out_dtype),
        grid_spec=grid_spec,
        compiler_params=pltpu.CompilerParams(
            dimension_semantics=dim_sem,
            vmem_limit_bytes=vmem_limit,
        ),
        cost_estimate=cost,
    )(x_in, w_stacked, b_stacked)

    return out[:B, :n_classes]


# --------------------------------------------------------------------------- #
# Initialization matching the module
# --------------------------------------------------------------------------- #
def init_heads(key, embed_dim, nb_classes_per_head):
    """trunc_normal_(std=0.02) (PyTorch truncates at absolute [-2, 2], which is
    ~100 sigma for std=0.02, i.e. effectively an untruncated normal); bias=0."""
    weights, biases = [], []
    for nb in nb_classes_per_head:
        key, sub = jax.random.split(key)
        w = jax.random.normal(sub, (nb, embed_dim), dtype=jnp.float32) * 0.02
        b = jnp.zeros((nb,), dtype=jnp.float32)
        weights.append(w)
        biases.append(b)
    return weights, biases


# TODO(synk): feat_expand=True path (per-head input x[ti]) not implemented;
# the module's default constructor uses feat_expand=False.  backup/recall/
# assign/update/optimizer-args are host-side bookkeeping: re-running
# prepare_classifier_params() after update() is the JAX-side equivalent.


if __name__ == "__main__":
    key = jax.random.PRNGKey(0)

    def run_case(key, B, D, nb_classes_per_head, compute_dtype, atol, rtol):
        key, kx = jax.random.split(key)
        x = jax.random.normal(kx, (B, D), dtype=jnp.float32)
        weights, biases = init_heads(key, D, nb_classes_per_head)
        # Stacking happens once, outside the forward path.
        w_s, b_s, n_cls = prepare_classifier_params(weights, biases, compute_dtype)
        out = incremental_classifier_forward(x, w_s, b_s, n_classes=n_cls)
        jax.block_until_ready(out)
        ref = jnp.concatenate([x @ w.T + b for w, b in zip(weights, biases)], axis=1)
        assert out.shape == (B, sum(nb_classes_per_head))
        err = float(jnp.max(jnp.abs(out - ref)))
        assert jnp.allclose(out, ref, atol=atol, rtol=rtol), f"max abs err {err}"
        return key

    # Case 1: tiny incremental setting (initial head + one update()): 10 + 10 classes.
    key = run_case(key, B=8, D=32, nb_classes_per_head=[10, 10],
                   compute_dtype=jnp.float32, atol=1e-5, rtol=1e-5)

    # Case 2: exercises lane padding + N tiling (C_total=300 -> C_pad=384, 3 N-tiles).
    key = run_case(key, B=24, D=96, nb_classes_per_head=[130, 70, 100],
                   compute_dtype=jnp.float32, atol=1e-4, rtol=1e-4)

    # Case 3: bf16 weight stream (memory-bound fast path), f32 accumulation.
    key = run_case(key, B=24, D=96, nb_classes_per_head=[130, 70, 100],
                   compute_dtype=jnp.bfloat16, atol=5e-2, rtol=5e-2)

    # Case 4: ViT-like embed_dim exercising the multi-K accumulator path
    #         (D=2048 -> tk=512, 4 K-steps).
    key = run_case(key, B=16, D=2048, nb_classes_per_head=[100, 100],
                   compute_dtype=jnp.float32, atol=1e-3, rtol=1e-3)

    print("KERNEL_OK")
</pallas_src>

<mosaic_0001>
module attributes {stable_mosaic.version = 11 : i64} {
  func.func @_classifier_kernel_single_k(%arg0: i32, %arg1: i32, %arg2: memref<8x32xf32, #tpu.memory_space<vmem>>, %arg3: memref<32x128xf32, #tpu.memory_space<vmem>>, %arg4: memref<1x128xf32, #tpu.memory_space<vmem>>, %arg5: memref<8x128xf32, #tpu.memory_space<vmem>>) attributes {dimension_semantics = [#tpu.dimension_semantics<parallel>, #tpu.dimension_semantics<parallel>], iteration_bounds = array<i64: 1, 1>, scalar_prefetch = 0 : i64, scratch_operands = 0 : i64, tpu.core_type = #tpu.core_type<tc>, window_params = [{transform_indices = @transform_0, window_bounds = array<i64: 8, 32>}, {transform_indices = @transform_1, window_bounds = array<i64: 32, 128>}, {transform_indices = @transform_2, window_bounds = array<i64: 1, 128>}, {transform_indices = @transform_3, window_bounds = array<i64: 8, 128>}]} {
    %c0 = arith.constant 0 : index
    %c0_0 = arith.constant 0 : index
    %0 = vector.load %arg2[%c0, %c0_0] : memref<8x32xf32, #tpu.memory_space<vmem>>, vector<8x32xf32>
    %c0_1 = arith.constant 0 : index
    %c0_2 = arith.constant 0 : index
    %1 = vector.load %arg3[%c0_1, %c0_2] : memref<32x128xf32, #tpu.memory_space<vmem>>, vector<32x128xf32>
    %cst = arith.constant dense<0.000000e+00> : vector<8x128xf32>
    %2 = tpu.matmul %0, %1, %cst {dimension_numbers = #tpu.dot_dimension_numbers<[1], [0], [0], [1], [0, 0, 1, 1], [], []>} : vector<8x32xf32>, vector<32x128xf32>, vector<8x128xf32> -> vector<8x128xf32>
    %c0_3 = arith.constant 0 : index
    %c0_4 = arith.constant 0 : index
    %3 = vector.load %arg4[%c0_3, %c0_4] : memref<1x128xf32, #tpu.memory_space<vmem>>, vector<1x128xf32>
    %4 = vector.broadcast %3 : vector<1x128xf32> to vector<8x128xf32>
    %5 = arith.addf %2, %4 : vector<8x128xf32>
    %c0_5 = arith.constant 0 : index
    %c0_6 = arith.constant 0 : index
    %6 = vector.load %arg5[%c0_5, %c0_6] : memref<8x128xf32, #tpu.memory_space<vmem>>, vector<8x128xf32>
    tpu.vector_store %arg5[%c0_5, %c0_6], %5 {strides = array<i32>} : memref<8x128xf32, #tpu.memory_space<vmem>>, vector<8x128xf32>,
    return
  }
  func.func @transform_0(%arg0: i32, %arg1: i32) -> (i32, i32) {
    %c0_i32 = arith.constant 0 : i32
    %c0_i32_0 = arith.constant 0 : i32
    return %arg0, %c0_i32 : i32, i32
  }
  func.func @transform_1(%arg0: i32, %arg1: i32) -> (i32, i32) {
    %c0_i32 = arith.constant 0 : i32
    %c0_i32_0 = arith.constant 0 : i32
    return %c0_i32, %arg1 : i32, i32
  }
  func.func @transform_2(%arg0: i32, %arg1: i32) -> (i32, i32) {
    %c0_i32 = arith.constant 0 : i32
    %c0_i32_0 = arith.constant 0 : i32
    return %c0_i32, %arg1 : i32, i32
  }
  func.func @transform_3(%arg0: i32, %arg1: i32) -> (i32, i32) {
    %c0_i32 = arith.constant 0 : i32
    return %arg0, %arg1 : i32, i32
  }
}

</mosaic_0001>

<bundles_post_ra>
// kernel: incremental_classifier_forward.1
= control target key start
LH: loop header
LB: loop body
LE: loop exit
PB: predicated region body
PF: predicated region fallthrough
CT: control target
= control target key end

     0   :  { %8 = vsyncpa [#allocation3], 0  ;;  %s219_s0 = inlined_call_operand.hbm [shape: f32[8,32], index: 0, kind: input, shape index: {}]   ;;  %s220_s1 = inlined_call_operand.hbm [shape: f32[32,128], index: 1, kind: input, shape index: {}]   ;;  %s221_s2 = inlined_call_operand.vmem [shape: f32[1,128], index: 2, kind: input, shape index: {}]   ;;  %s222_s3 = inlined_call_operand.hbm [shape: f32[8,128], index: 3, kind: output, shape index: {}]  }
   0x1   :  { %9 = vsyncpa [#allocation6], 0 }
   0x2   :  { %10 = vsyncpa [#allocation4], 0  ;;  %s16_s14 = sshll.u32 %s219_s0, 4  ;;  %s182_s15 = smov [#allocation2]   ;;  %s17_s14 = int_to_ptr.hbm [resolvable:$true] %s16_s14 }
   0x3   :  { %s18_s16 = sshll.u32 %s182_s15, 4  ;;  %s26_s19 = sshll.u32 %s220_s1, 4  ;;  %s19_s16 = int_to_ptr.vmem [resolvable:$true] %s18_s16  ;;  %s27_s19 = int_to_ptr.hbm [resolvable:$true] %s26_s19 }
   0x4   :  { %21 = dma.hbm_to_vmem [thread:$0]  %s17_s14, 128, %s19_s16, [#allocation3]  }
   0x5   :  { %s183_s20 = smov [#allocation5]   ;;  %s184_s22 = smov 128  }
   0x6   :  { %s28_s21 = sshll.u32 %s183_s20, 4  ;;  %s185_s23 = smov 8   ;;  %s29_s21 = int_to_ptr.vmem [resolvable:$true] %s28_s21 }
   0x7   :  { %34 = dma.hbm_to_vmem [thread:$0]  %s27_s19, 512, %s29_s21, [#allocation6], %s184_s22, %s184_s22, %s185_s23  }
   0x8   :  { %176 = dma.done.wait [#allocation3], 128  }
   0x9   :  { %177 = vsyncadd [#allocation3], 4294967168 }
   0xa   :  { %178 = dma.done.wait [#allocation6], 512  }
   0xb   :  { %179 = vsyncadd [#allocation6], 4294966784  ;;  %v49_v0 = vld [vmem:[#allocation5 + $0x18] sm:$0xff]  ;;  %v48_v1 = vld [vmem:[#allocation5 + $0x10] sm:$0xff]  ;;  %vm54_vm0 = vcmask 261120   ;;  %s186_s24 = smov [#allocation7]  }
   0xc   :  { %70 = vmatpush.msra.mxu0 %v49_v0  ;;  %v47_v2 = vld [vmem:[#allocation5 + $0x8] sm:$0xff]  ;;  %v46_v3 = vld [vmem:[#allocation5] sm:$0xff]  ;;  %v45_v4 = vld [vmem:[#allocation2] sm:$0xff]  ;;  %s84_s25 = sshll.u32 %s186_s24, 4  ;;  %s86_s28 = sshll.u32 %s222_s3, 4  ;;  %s85_s25 = int_to_ptr.vmem [resolvable:$true] %s84_s25  ;;  %s87_s28 = int_to_ptr.hbm [resolvable:$true] %s86_s28 }
   0xd   :  { %v103_v5 = vld [vmem:[%s221_s2] ss:$0 sm:$0xff] }
   0xe   :  { %71 = vmatpush.msra.mxu0 %v48_v1 }
  0x10   :  { %72 = vmatpush.msra.mxu0 %v47_v2 }
  0x12   :  { %73 = vmatpush.msra.mxu0 %v46_v3 }
  0x13   :  { %97 = vmatmul.msk.f32.vlgmr.msra.gmra.mxu0 %vm54_vm0, %v45_v4 }
  0x90   :  { %v75_v6 = vpop.f32.mrf.mxu0 }
  0x91   :  { %v76_v7 = vadd.f32 %v103_v5, %v75_v6 }
  0x93   :  { %78 = vst [vmem:[#allocation7] sm:$0xff] %v76_v7 }
  0x94   :  { %89 = dma.vmem_to_hbm [thread:$0]  %s85_s25, 128, %s87_s28, [#allocation4]  }
  0x95   :  { %180 = dma.done.wait [#allocation4], 128  }
  0x96   :  { %181 = vsyncadd [#allocation4], 4294967168 }
  0x97   :  { %94 = vsyncpa [#allocation3], 1 }
  0x98   :  { %95 = vsyncpa [#allocation6], 1 }
  0x99   :  { %96 = vsyncpa [#allocation4], 1 }

</bundles_post_ra>
